<compile_context>
chip_gen: v7x
topology: tpu7x:2x2x1
jax: 0.10.0
libtpu: 0.0.40
codegen_flags: <defaults>
</compile_context>

<pallas_src>
import jax
import jax.numpy as jnp
import numpy as np
from jax.experimental import pallas as pl
from jax.experimental.pallas import tpu as pltpu

EPS = 1e-5


def _instance_norm(x):
    # x: (C, HW) f32. Matches torch: mean over HW, unbiased variance (/(HW-1)),
    # eps added to var before sqrt. One-pass stats + rsqrt (EUP).
    hw = x.shape[1]
    ssum = jnp.sum(x, axis=1, keepdims=True)          # (C,1)
    ssq = jnp.sum(x * x, axis=1, keepdims=True)       # (C,1)
    mean = ssum * (1.0 / hw)
    var = (ssq - hw * mean * mean) * (1.0 / (hw - 1))
    return (x - mean) * jax.lax.rsqrt(var + EPS)


def mcc_kernel(c_ref, s_ref, wg_ref, bg_ref, wf_ref, bf_ref,
               wfc_ref, bfc_ref, wout_ref, bout_ref, o_ref):
    # ---------------- style path: FC_S stays on-chip ----------------
    s = s_ref[0]                                                  # (C, HWs)
    sn = _instance_norm(s)
    g = jnp.dot(wg_ref[...], sn,
                preferred_element_type=jnp.float32) + bg_ref[...]  # g() 1x1 conv
    g_sum = jnp.sum(g, axis=1, keepdims=True)                      # (C,1) G_Fs_sum
    g_sq = jnp.sum(g * g, axis=1, keepdims=True)                   # (C,1) bmm diag
    fcs = g_sq / g_sum                                             # FC_S pre-fc
    # fc (Linear over channel dim): Wfc @ fcs + bfc -> per-channel scale (C,1)
    fcs = jnp.dot(wfc_ref[...], fcs,
                  preferred_element_type=jnp.float32) + bfc_ref[...]

    # --------- fold FC_S scale + both 1x1 convs into one weight -----------
    # Wout @ diag(fcs) @ Wf  ==  Wout @ (fcs * Wf)   (fcs row-scales Wf)
    w_co = jnp.dot(wout_ref[...], fcs * wf_ref[...],
                   preferred_element_type=jnp.float32)             # (C,C)
    b_co = jnp.dot(wout_ref[...], fcs * bf_ref[...],
                   preferred_element_type=jnp.float32) + bout_ref[...]  # (C,1)

    # ---------------- content path: single big matmul ----------------
    x = c_ref[0]                                                   # (C, HW)
    xn = _instance_norm(x)
    out = jnp.dot(w_co, xn, preferred_element_type=jnp.float32) + b_co
    o_ref[0] = x + out                                             # residual add


def mcc_forward(content, style, params):
    B, C, H, W = content.shape
    Bs, Cs, Hs, Ws = style.shape
    assert B == Bs and C == Cs, "batch/channels of content and style must match"
    HW, HWs = H * W, Hs * Ws

    c3 = content.reshape(B, C, HW).astype(jnp.float32)
    s3 = style.reshape(Bs, Cs, HWs).astype(jnp.float32)

    out3 = pl.pallas_call(
        mcc_kernel,
        out_shape=jax.ShapeDtypeStruct((B, C, HW), jnp.float32),
        grid=(B,),
        in_specs=[
            pl.BlockSpec((1, C, HW), lambda b: (b, 0, 0)),     # content slab
            pl.BlockSpec((1, Cs, HWs), lambda b: (b, 0, 0)),   # style slab
            pl.BlockSpec((Cs, Cs), lambda b: (0, 0)),          # wg
            pl.BlockSpec((Cs, 1), lambda b: (0, 0)),           # bg
            pl.BlockSpec((C, C), lambda b: (0, 0)),            # wf
            pl.BlockSpec((C, 1), lambda b: (0, 0)),            # bf
            pl.BlockSpec((C, C), lambda b: (0, 0)),            # wfc
            pl.BlockSpec((C, 1), lambda b: (0, 0)),            # bfc
            pl.BlockSpec((C, C), lambda b: (0, 0)),            # wout
            pl.BlockSpec((C, 1), lambda b: (0, 0)),            # bout
        ],
        out_specs=pl.BlockSpec((1, C, HW), lambda b: (b, 0, 0)),
        compiler_params=pltpu.CompilerParams(
            dimension_semantics=("parallel",)),                # v7x: 1 batch / TC
    )(c3, s3, params["wg"], params["bg"], params["wf"], params["bf"],
      params["wfc"], params["bfc"], params["wout"], params["bout"])

    return out3.reshape(B, C, H, W)


# ---------------- pure-JAX reference (correctness check only) -----------------
def _normal_ref(x):
    B, C, H, W = x.shape
    v = x.reshape(B, C, -1)
    mean = v.mean(-1).reshape(B, C, 1, 1)
    var = v.var(-1, ddof=1).reshape(B, C, 1, 1) + EPS
    return (x - mean) / jnp.sqrt(var)


def mcc_ref(content, style, params):
    hi = jax.lax.Precision.HIGHEST
    B, C, H, W = content.shape
    conv = lambda x, w, b: jnp.einsum("oc,bcp->bop", w,
                                      x.reshape(x.shape[0], x.shape[1], -1),
                                      precision=hi) + b.reshape(1, -1, 1)
    f = conv(_normal_ref(content), params["wf"], params["bf"]).reshape(B, C, H, W)
    g = conv(_normal_ref(style), params["wg"], params["bg"])            # (B,C,HWs)
    g_sum = g.sum(-1)
    fc_s = (g * g).sum(-1) / g_sum                                      # (B,C)
    fc_s = jnp.einsum("bc,oc->bo", fc_s, params["wfc"], precision=hi) \
        + params["bfc"].reshape(1, -1)
    out = f * fc_s.reshape(B, C, 1, 1)
    out = conv(out, params["wout"], params["bout"]).reshape(B, C, H, W)
    return content + out


if __name__ == "__main__":
    B, C = 2, 32          # in_dim = 32
    H = W = 16            # content spatial
    Hs = Ws = 8           # style spatial

    key = jax.random.PRNGKey(0)
    ks = jax.random.split(key, 10)
    content = jax.random.normal(ks[0], (B, C, H, W), jnp.float32)
    style = jax.random.normal(ks[1], (B, C, Hs, Ws), jnp.float32)

    # Deterministic synthetic parameters (Conv2d 1x1 weights squeezed to (C,C),
    # biases kept as (C,1) columns; fc = Linear(C, C)).
    scale = 1.0 / np.sqrt(C)
    params = {
        "wf":   jax.random.normal(ks[2], (C, C), jnp.float32) * scale,
        "bf":   jax.random.normal(ks[3], (C, 1), jnp.float32) * 0.1,
        "wg":   jax.random.normal(ks[4], (C, C), jnp.float32) * scale,
        "bg":   jax.random.normal(ks[5], (C, 1), jnp.float32) * 0.1,
        "wout": jax.random.normal(ks[6], (C, C), jnp.float32) * scale,
        "bout": jax.random.normal(ks[7], (C, 1), jnp.float32) * 0.1,
        "wfc":  jax.random.normal(ks[8], (C, C), jnp.float32) * scale,
        "bfc":  jax.random.normal(ks[9], (C, 1), jnp.float32) * 0.1,
    }

    out = jax.block_until_ready(mcc_forward(content, style, params))
    ref = jax.block_until_ready(mcc_ref(content, style, params))

    assert out.shape == (B, C, H, W)
    np.testing.assert_allclose(np.asarray(out), np.asarray(ref),
                               rtol=1e-3, atol=1e-3)
    print("KERNEL_OK")
</pallas_src>

<mosaic_0001>
module attributes {stable_mosaic.version = 11 : i64} {
  func.func @mcc_kernel(%arg0: i32, %arg1: memref<1x32x256xf32, #tpu.memory_space<vmem>>, %arg2: memref<1x32x64xf32, #tpu.memory_space<vmem>>, %arg3: memref<32x32xf32, #tpu.memory_space<vmem>>, %arg4: memref<32x1xf32, #tpu.memory_space<vmem>>, %arg5: memref<32x32xf32, #tpu.memory_space<vmem>>, %arg6: memref<32x1xf32, #tpu.memory_space<vmem>>, %arg7: memref<32x32xf32, #tpu.memory_space<vmem>>, %arg8: memref<32x1xf32, #tpu.memory_space<vmem>>, %arg9: memref<32x32xf32, #tpu.memory_space<vmem>>, %arg10: memref<32x1xf32, #tpu.memory_space<vmem>>, %arg11: memref<1x32x256xf32, #tpu.memory_space<vmem>>) attributes {dimension_semantics = [#tpu.dimension_semantics<parallel>], iteration_bounds = array<i64: 2>, scalar_prefetch = 0 : i64, scratch_operands = 0 : i64, tpu.core_type = #tpu.core_type<tc>, window_params = [{transform_indices = @transform_0, window_bounds = array<i64: 1, 32, 256>}, {transform_indices = @transform_1, window_bounds = array<i64: 1, 32, 64>}, {pipeline_mode = #tpu.pipeline_mode<synchronous>, transform_indices = @transform_2, window_bounds = array<i64: 32, 32>}, {pipeline_mode = #tpu.pipeline_mode<synchronous>, transform_indices = @transform_3, window_bounds = array<i64: 32, 1>}, {pipeline_mode = #tpu.pipeline_mode<synchronous>, transform_indices = @transform_4, window_bounds = array<i64: 32, 32>}, {pipeline_mode = #tpu.pipeline_mode<synchronous>, transform_indices = @transform_5, window_bounds = array<i64: 32, 1>}, {pipeline_mode = #tpu.pipeline_mode<synchronous>, transform_indices = @transform_6, window_bounds = array<i64: 32, 32>}, {pipeline_mode = #tpu.pipeline_mode<synchronous>, transform_indices = @transform_7, window_bounds = array<i64: 32, 1>}, {pipeline_mode = #tpu.pipeline_mode<synchronous>, transform_indices = @transform_8, window_bounds = array<i64: 32, 32>}, {pipeline_mode = #tpu.pipeline_mode<synchronous>, transform_indices = @transform_9, window_bounds = array<i64: 32, 1>}, {transform_indices = @transform_10, window_bounds = array<i64: 1, 32, 256>}]} {
    %c0 = arith.constant 0 : index
    %c0_0 = arith.constant 0 : index
    %c0_1 = arith.constant 0 : index
    %0 = vector.load %arg2[%c0, %c0_0, %c0_1] : memref<1x32x64xf32, #tpu.memory_space<vmem>>, vector<1x32x64xf32>
    %1 = vector.shape_cast %0 : vector<1x32x64xf32> to vector<32x64xf32>
    %cst = arith.constant dense<0.000000e+00> : vector<32xf32>
    %2 = vector.multi_reduction <add>, %1, %cst [1] : vector<32x64xf32> to vector<32xf32>
    %3 = vector.shape_cast %2 : vector<32xf32> to vector<32x1xf32>
    %4 = arith.mulf %1, %1 : vector<32x64xf32>
    %cst_2 = arith.constant dense<0.000000e+00> : vector<32xf32>
    %5 = vector.multi_reduction <add>, %4, %cst_2 [1] : vector<32x64xf32> to vector<32xf32>
    %6 = vector.shape_cast %5 : vector<32xf32> to vector<32x1xf32>
    %cst_3 = arith.constant 1.562500e-02 : f32
    %7 = vector.broadcast %cst_3 : f32 to vector<32x1xf32>
    %8 = arith.mulf %3, %7 : vector<32x1xf32>
    %cst_4 = arith.constant 6.400000e+01 : f32
    %9 = vector.broadcast %cst_4 : f32 to vector<32x1xf32>
    %10 = arith.mulf %9, %8 : vector<32x1xf32>
    %11 = arith.mulf %10, %8 : vector<32x1xf32>
    %12 = arith.subf %6, %11 : vector<32x1xf32>
    %cst_5 = arith.constant 0.0158730168 : f32
    %13 = vector.broadcast %cst_5 : f32 to vector<32x1xf32>
    %14 = arith.mulf %12, %13 : vector<32x1xf32>
    %15 = vector.broadcast %8 : vector<32x1xf32> to vector<32x64xf32>
    %16 = arith.subf %1, %15 : vector<32x64xf32>
    %cst_6 = arith.constant 9.99999974E-6 : f32
    %17 = vector.broadcast %cst_6 : f32 to vector<32x1xf32>
    %18 = arith.addf %14, %17 : vector<32x1xf32>
    %19 = math.rsqrt %18 : vector<32x1xf32>
    %20 = vector.broadcast %19 : vector<32x1xf32> to vector<32x64xf32>
    %21 = arith.mulf %16, %20 : vector<32x64xf32>
    %c0_7 = arith.constant 0 : index
    %c0_8 = arith.constant 0 : index
    %22 = vector.load %arg3[%c0_7, %c0_8] : memref<32x32xf32, #tpu.memory_space<vmem>>, vector<32x32xf32>
    %cst_9 = arith.constant dense<0.000000e+00> : vector<32x64xf32>
    %23 = tpu.matmul %22, %21, %cst_9 {dimension_numbers = #tpu.dot_dimension_numbers<[1], [0], [0], [1], [0, 0, 1, 1], [], []>} : vector<32x32xf32>, vector<32x64xf32>, vector<32x64xf32> -> vector<32x64xf32>
    %c0_10 = arith.constant 0 : index
    %c0_11 = arith.constant 0 : index
    %24 = vector.load %arg4[%c0_10, %c0_11] : memref<32x1xf32, #tpu.memory_space<vmem>>, vector<32x1xf32>
    %25 = vector.broadcast %24 : vector<32x1xf32> to vector<32x64xf32>
    %26 = arith.addf %23, %25 : vector<32x64xf32>
    %cst_12 = arith.constant dense<0.000000e+00> : vector<32xf32>
    %27 = vector.multi_reduction <add>, %26, %cst_12 [1] : vector<32x64xf32> to vector<32xf32>
    %28 = vector.shape_cast %27 : vector<32xf32> to vector<32x1xf32>
    %29 = arith.mulf %26, %26 : vector<32x64xf32>
    %cst_13 = arith.constant dense<0.000000e+00> : vector<32xf32>
    %30 = vector.multi_reduction <add>, %29, %cst_13 [1] : vector<32x64xf32> to vector<32xf32>
    %31 = vector.shape_cast %30 : vector<32xf32> to vector<32x1xf32>
    %32 = arith.divf %31, %28 : vector<32x1xf32>
    %c0_14 = arith.constant 0 : index
    %c0_15 = arith.constant 0 : index
    %33 = vector.load %arg7[%c0_14, %c0_15] : memref<32x32xf32, #tpu.memory_space<vmem>>, vector<32x32xf32>
    %cst_16 = arith.constant dense<0.000000e+00> : vector<32x1xf32>
    %34 = tpu.matmul %33, %32, %cst_16 {dimension_numbers = #tpu.dot_dimension_numbers<[1], [0], [0], [1], [0, 0, 1, 1], [], []>} : vector<32x32xf32>, vector<32x1xf32>, vector<32x1xf32> -> vector<32x1xf32>
    %c0_17 = arith.constant 0 : index
    %c0_18 = arith.constant 0 : index
    %35 = vector.load %arg8[%c0_17, %c0_18] : memref<32x1xf32, #tpu.memory_space<vmem>>, vector<32x1xf32>
    %36 = arith.addf %34, %35 : vector<32x1xf32>
    %c0_19 = arith.constant 0 : index
    %c0_20 = arith.constant 0 : index
    %37 = vector.load %arg9[%c0_19, %c0_20] : memref<32x32xf32, #tpu.memory_space<vmem>>, vector<32x32xf32>
    %c0_21 = arith.constant 0 : index
    %c0_22 = arith.constant 0 : index
    %38 = vector.load %arg5[%c0_21, %c0_22] : memref<32x32xf32, #tpu.memory_space<vmem>>, vector<32x32xf32>
    %39 = vector.broadcast %36 : vector<32x1xf32> to vector<32x32xf32>
    %40 = arith.mulf %39, %38 : vector<32x32xf32>
    %cst_23 = arith.constant dense<0.000000e+00> : vector<32x32xf32>
    %41 = tpu.matmul %37, %40, %cst_23 {dimension_numbers = #tpu.dot_dimension_numbers<[1], [0], [0], [1], [0, 0, 1, 1], [], []>} : vector<32x32xf32>, vector<32x32xf32>, vector<32x32xf32> -> vector<32x32xf32>
    %c0_24 = arith.constant 0 : index
    %c0_25 = arith.constant 0 : index
    %42 = vector.load %arg9[%c0_24, %c0_25] : memref<32x32xf32, #tpu.memory_space<vmem>>, vector<32x32xf32>
    %c0_26 = arith.constant 0 : index
    %c0_27 = arith.constant 0 : index
    %43 = vector.load %arg6[%c0_26, %c0_27] : memref<32x1xf32, #tpu.memory_space<vmem>>, vector<32x1xf32>
    %44 = arith.mulf %36, %43 : vector<32x1xf32>
    %cst_28 = arith.constant dense<0.000000e+00> : vector<32x1xf32>
    %45 = tpu.matmul %42, %44, %cst_28 {dimension_numbers = #tpu.dot_dimension_numbers<[1], [0], [0], [1], [0, 0, 1, 1], [], []>} : vector<32x32xf32>, vector<32x1xf32>, vector<32x1xf32> -> vector<32x1xf32>
    %c0_29 = arith.constant 0 : index
    %c0_30 = arith.constant 0 : index
    %46 = vector.load %arg10[%c0_29, %c0_30] : memref<32x1xf32, #tpu.memory_space<vmem>>, vector<32x1xf32>
    %47 = arith.addf %45, %46 : vector<32x1xf32>
    %c0_31 = arith.constant 0 : index
    %c0_32 = arith.constant 0 : index
    %c0_33 = arith.constant 0 : index
    %48 = vector.load %arg1[%c0_31, %c0_32, %c0_33] : memref<1x32x256xf32, #tpu.memory_space<vmem>>, vector<1x32x256xf32>
    %49 = vector.shape_cast %48 : vector<1x32x256xf32> to vector<32x256xf32>
    %cst_34 = arith.constant dense<0.000000e+00> : vector<32xf32>
    %50 = vector.multi_reduction <add>, %49, %cst_34 [1] : vector<32x256xf32> to vector<32xf32>
    %51 = vector.shape_cast %50 : vector<32xf32> to vector<32x1xf32>
    %52 = arith.mulf %49, %49 : vector<32x256xf32>
    %cst_35 = arith.constant dense<0.000000e+00> : vector<32xf32>
    %53 = vector.multi_reduction <add>, %52, %cst_35 [1] : vector<32x256xf32> to vector<32xf32>
    %54 = vector.shape_cast %53 : vector<32xf32> to vector<32x1xf32>
    %cst_36 = arith.constant 3.906250e-03 : f32
    %55 = vector.broadcast %cst_36 : f32 to vector<32x1xf32>
    %56 = arith.mulf %51, %55 : vector<32x1xf32>
    %cst_37 = arith.constant 2.560000e+02 : f32
    %57 = vector.broadcast %cst_37 : f32 to vector<32x1xf32>
    %58 = arith.mulf %57, %56 : vector<32x1xf32>
    %59 = arith.mulf %58, %56 : vector<32x1xf32>
    %60 = arith.subf %54, %59 : vector<32x1xf32>
    %cst_38 = arith.constant 0.00392156886 : f32
    %61 = vector.broadcast %cst_38 : f32 to vector<32x1xf32>
    %62 = arith.mulf %60, %61 : vector<32x1xf32>
    %63 = vector.broadcast %56 : vector<32x1xf32> to vector<32x256xf32>
    %64 = arith.subf %49, %63 : vector<32x256xf32>
    %cst_39 = arith.constant 9.99999974E-6 : f32
    %65 = vector.broadcast %cst_39 : f32 to vector<32x1xf32>
    %66 = arith.addf %62, %65 : vector<32x1xf32>
    %67 = math.rsqrt %66 : vector<32x1xf32>
    %68 = vector.broadcast %67 : vector<32x1xf32> to vector<32x256xf32>
    %69 = arith.mulf %64, %68 : vector<32x256xf32>
    %cst_40 = arith.constant dense<0.000000e+00> : vector<32x256xf32>
    %70 = tpu.matmul %41, %69, %cst_40 {dimension_numbers = #tpu.dot_dimension_numbers<[1], [0], [0], [1], [0, 0, 1, 1], [], []>} : vector<32x32xf32>, vector<32x256xf32>, vector<32x256xf32> -> vector<32x256xf32>
    %71 = vector.broadcast %47 : vector<32x1xf32> to vector<32x256xf32>
    %72 = arith.addf %70, %71 : vector<32x256xf32>
    %73 = arith.addf %49, %72 : vector<32x256xf32>
    %c0_41 = arith.constant 0 : index
    %c0_42 = arith.constant 0 : index
    %c0_43 = arith.constant 0 : index
    %74 = vector.load %arg11[%c0_41, %c0_42, %c0_43] : memref<1x32x256xf32, #tpu.memory_space<vmem>>, vector<1x32x256xf32>
    %75 = vector.shape_cast %74 : vector<1x32x256xf32> to vector<32x256xf32>
    %76 = vector.shape_cast %73 : vector<32x256xf32> to vector<1x32x256xf32>
    tpu.vector_store %arg11[%c0_41, %c0_42, %c0_43], %76 {strides = array<i32>} : memref<1x32x256xf32, #tpu.memory_space<vmem>>, vector<1x32x256xf32>,
    return
  }
  func.func @transform_0(%arg0: i32) -> (i32, i32, i32) {
    %c0_i32 = arith.constant 0 : i32
    %c0_i32_0 = arith.constant 0 : i32
    %c0_i32_1 = arith.constant 0 : i32
    return %arg0, %c0_i32, %c0_i32_0 : i32, i32, i32
  }
  func.func @transform_1(%arg0: i32) -> (i32, i32, i32) {
    %c0_i32 = arith.constant 0 : i32
    %c0_i32_0 = arith.constant 0 : i32
    %c0_i32_1 = arith.constant 0 : i32
    return %arg0, %c0_i32, %c0_i32_0 : i32, i32, i32
  }
  func.func @transform_2(%arg0: i32) -> (i32, i32) {
    %c0_i32 = arith.constant 0 : i32
    %c0_i32_0 = arith.constant 0 : i32
    %c0_i32_1 = arith.constant 0 : i32
    return %c0_i32, %c0_i32_0 : i32, i32
  }
  func.func @transform_3(%arg0: i32) -> (i32, i32) {
    %c0_i32 = arith.constant 0 : i32
    %c0_i32_0 = arith.constant 0 : i32
    %c0_i32_1 = arith.constant 0 : i32
    return %c0_i32, %c0_i32_0 : i32, i32
  }
  func.func @transform_4(%arg0: i32) -> (i32, i32) {
    %c0_i32 = arith.constant 0 : i32
    %c0_i32_0 = arith.constant 0 : i32
    %c0_i32_1 = arith.constant 0 : i32
    return %c0_i32, %c0_i32_0 : i32, i32
  }
  func.func @transform_5(%arg0: i32) -> (i32, i32) {
    %c0_i32 = arith.constant 0 : i32
    %c0_i32_0 = arith.constant 0 : i32
    %c0_i32_1 = arith.constant 0 : i32
    return %c0_i32, %c0_i32_0 : i32, i32
  }
  func.func @transform_6(%arg0: i32) -> (i32, i32) {
    %c0_i32 = arith.constant 0 : i32
    %c0_i32_0 = arith.constant 0 : i32
    %c0_i32_1 = arith.constant 0 : i32
    return %c0_i32, %c0_i32_0 : i32, i32
  }
  func.func @transform_7(%arg0: i32) -> (i32, i32) {
    %c0_i32 = arith.constant 0 : i32
    %c0_i32_0 = arith.constant 0 : i32
    %c0_i32_1 = arith.constant 0 : i32
    return %c0_i32, %c0_i32_0 : i32, i32
  }
  func.func @transform_8(%arg0: i32) -> (i32, i32) {
    %c0_i32 = arith.constant 0 : i32
    %c0_i32_0 = arith.constant 0 : i32
    %c0_i32_1 = arith.constant 0 : i32
    return %c0_i32, %c0_i32_0 : i32, i32
  }
  func.func @transform_9(%arg0: i32) -> (i32, i32) {
    %c0_i32 = arith.constant 0 : i32
    %c0_i32_0 = arith.constant 0 : i32
    %c0_i32_1 = arith.constant 0 : i32
    return %c0_i32, %c0_i32_0 : i32, i32
  }
  func.func @transform_10(%arg0: i32) -> (i32, i32, i32) {
    %c0_i32 = arith.constant 0 : i32
    %c0_i32_0 = arith.constant 0 : i32
    %c0_i32_1 = arith.constant 0 : i32
    return %arg0, %c0_i32, %c0_i32_0 : i32, i32, i32
  }
}

</mosaic_0001>

<bundles_post_ra>
// kernel: tpu_custom_call.1
= control target key start
LH: loop header
LB: loop body
LE: loop exit
PB: predicated region body
PF: predicated region fallthrough
CT: control target
= control target key end

     0   :  { %s2355_s0 = inlined_call_operand.vmem [shape: f32[2,32,256], index: 0, kind: input, shape index: {}]   ;;  %s2356_s1 = inlined_call_operand.hbm [shape: f32[2,32,64], index: 1, kind: input, shape index: {}]   ;;  %s2357_s2 = inlined_call_operand.hbm [shape: f32[32,32], index: 2, kind: input, shape index: {}]   ;;  %s2358_s3 = inlined_call_operand.vmem [shape: f32[32,1], index: 3, kind: input, shape index: {}]   ;;  %s2359_s4 = inlined_call_operand.hbm [shape: f32[32,32], index: 4, kind: input, shape index: {}]   ;;  %s2360_s5 = inlined_call_operand.vmem [shape: f32[32,1], index: 5, kind: input, shape index: {}]   ;;  %s2361_s6 = inlined_call_operand.hbm [shape: f32[32,32], index: 6, kind: input, shape index: {}]   ;;  %s2362_s7 = inlined_call_operand.vmem [shape: f32[32,1], index: 7, kind: input, shape index: {}]   ;;  %s2363_s8 = inlined_call_operand.vmem [shape: f32[32,32], index: 8, kind: input, shape index: {}]   ;;  %s2364_s9 = inlined_call_operand.vmem [shape: f32[32,1], index: 9, kind: input, shape index: {}]   ;;  %s2365_s10 = inlined_call_operand.hbm [shape: f32[2,32,256], index: 10, kind: output, shape index: {}]  }
   0x1   :  { %2373 = sst [smem:[#allocation17_spill]] %s2364_s9 }
   0x2   :  { %2374 = sst [smem:[#allocation18_spill]] %s2365_s10 }
   0x3   :  { %15 = vsyncpa [#allocation3], 0 }
   0x4   :  { %17 = vsyncpa [#allocation3 + $0x1], 0 }
   0x5   :  { %18 = vsyncpa [#allocation6], 0 }
   0x6   :  { %19 = vsyncpa [#allocation9], 0 }
   0x7   :  { %20 = vsyncpa [#allocation4], 0 }
   0x8   :  { %22 = vsyncpa [#allocation4 + $0x1], 0  ;;  %s1891_s13 = smov 0   ;;  %s1893_s14 = smov 0  }
   0x9   :  { %s1895_s15 = smov 0   ;;  %s1897_s16 = smov 0  }
   0xa LB: > { %2375 = sst [smem:[#allocation15_spill]] %s1811_s13  ;;  %s1912_s17 = sadd.s32 4294967295, %s1823_s16   ;;  %s1823_s16 = sphi %s1897_s16, %s2401_s16   ;;  %s1819_s15 = sphi %s1895_s15, %s2400_s15   ;;  %s1815_s14 = sphi %s1893_s14, %s2399_s14   ;;  %s1811_s13 = sphi %s1891_s13, %s2398_s13  }
   0xb   : > { %s1353_s18 = sadd.s32 4294967294, %s1823_s16   ;;  %p74_p0 = scmp.ne.s32.totalorder %s1815_s14, %s1811_s13 }
   0xc   : > { %p2366_p1 = scmp.eq.s32.totalorder %s1912_s17, 0  ;;  %p272_p3 = scmp.eq.s32.totalorder %s1353_s18, 1 }
   0xd   : > { %p1354_p5 = scmp.ge.s32.totalorder %s1823_s16, 1  ;;  %p279_p7 = scmp.lt.s32.totalorder %s1823_s16, 3 }
   0xe   : > { %p1921_p4 = por %p2366_p1, %p74_p0  ;;  %p1926_p6 = por %p272_p3, %p74_p0 }
   0xf   : > { %p1931_p8 = pnand %p1354_p5, %p279_p7  ;;  %s1825_s22 = smov [#allocation5]  }
  0x10   : > { %s2376_s19 = scalar_select %p1921_p4, 1, 0 }
  0x11   : > { %s2377_s20 = scalar_select %p1926_p6, 1, 0 }
  0x12   : > { %s2379_s21 = scalar_select %p1931_p8, 1, 0 }
  0x13   : > { %2378 = sst [smem:[#allocation16_spill]] %s2377_s20  ;;  %s291_s23 = sshll.u32 %s1825_s22, 4  ;;  %s1935_s23 = int_to_ptr.vmem [resolvable:$true] %s291_s23 }
  0x14   : > { %p1542_p9 = pneg %p1931_p8  ;;  %s1826_s25 = smov [#allocation7]  }
  0x15   : > { %s307_s26 = sshll.u32 %s1826_s25, 4  ;;  %s1827_s27 = smov [#allocation8]   ;;  %s1946_s26 = int_to_ptr.vmem [resolvable:$true] %s307_s26 }
  0x16   : > { %p1942_p11 = pnand %p1542_p9, %p2366_p1  ;;  %s1948_s28 = sshll.u32 %s1827_s27, 4  ;;  %s324_s28 = int_to_ptr.vmem [resolvable:$true] %s1948_s28 }
  0x17   : > { %s1635_s11 = scalar_lea.hbm %s2357_s2, 512 }
  0x18   : > { %p1636_p12 = scmp.ne.s32.totalorder %s2357_s2, %s1635_s11  ;;  %p1958_p13 = pneg %p1942_p11 }
  0x19   : > { %p1642_p5 = scmp.lt.u32.totalorder %s1635_s11, %s2357_s2 }
  0x1a   : > { %p1638_p0 = pnand %p1958_p13, %p1636_p12 }
  0x1c   : > { %p1639_p3 = pneg %p1638_p0 }
  0x1e   : > { %p1644_p7 = pnand %p1642_p5, %p1639_p3 }
  0x20   : > { %1647 = shalt.err (!%p1644_p7)
}
  0x21   : > { %s1648_s29 = scalar_lea.vmem %s1935_s23, 512  ;;  %p1656_p2 = scmp.lt.s32.totalorder %s1935_s23, %s1935_s23 }
  0x22   : > { %p1649_p9 = scmp.ne.s32.totalorder %s1935_s23, %s1648_s29  ;;  %p1657_p6 = scmp.lt.s32.totalorder %s1648_s29, %s1648_s29 }
  0x24   : > { %p1651_p10 = pnand %p1649_p9, %p1958_p13  ;;  %p1658_p12 = por %p1657_p6, %p1656_p2 }
  0x26   : > { %p1652_p1 = pneg %p1651_p10 }
  0x28   : > { %p1659_p0 = pnand %p1658_p12, %p1652_p1 }
  0x2a   : > { %1662 = shalt.err (!%p1659_p0)
}
  0x2b   : > { %s1828_s30 = smov 128   ;;  %s1829_s11 = smov 8  }
  0x2c   : > { %1545 = dma.hbm_to_vmem [thread:$0]  (!%p1942_p11), %s2357_s2, 512, %s1935_s23, [#allocation6], %s1828_s30, %s1828_s30, %s1829_s11  }
  0x2d   : > { %s1663_s29 = scalar_lea.hbm %s2359_s4, 512 }
  0x2e   : > { %p1664_p1 = scmp.ne.s32.totalorder %s2359_s4, %s1663_s29  ;;  %p1670_p10 = scmp.lt.u32.totalorder %s1663_s29, %s2359_s4 }
  0x30   : > { %p1666_p2 = pnand %p1664_p1, %p1958_p13 }
  0x32   : > { %p1667_p6 = pneg %p1666_p2 }
  0x34   : > { %p1672_p3 = pnand %p1670_p10, %p1667_p6 }
  0x36   : > { %1675 = shalt.err (!%p1672_p3)
}
  0x37   : > { %s1676_s23 = scalar_lea.vmem %s1946_s26, 512  ;;  %p1684_p12 = scmp.lt.s32.totalorder %s1946_s26, %s1946_s26 }
  0x38   : > { %p1677_p5 = scmp.ne.s32.totalorder %s1946_s26, %s1676_s23  ;;  %p1685_p0 = scmp.lt.s32.totalorder %s1676_s23, %s1676_s23 }
  0x3a   : > { %p1679_p7 = pnand %p1677_p5, %p1958_p13  ;;  %p1686_p1 = por %p1685_p0, %p1684_p12 }
  0x3c   : > { %p1680_p9 = pneg %p1679_p7 }
  0x3e   : > { %p1687_p2 = pnand %p1686_p1, %p1680_p9 }
  0x40   : > { %1690 = shalt.err (!%p1687_p2)
}
  0x41   : > { %1548 = dma.hbm_to_vmem [thread:$0]  (!%p1942_p11), %s2359_s4, 512, %s1946_s26, [#allocation6], %s1828_s30, %s1828_s30, %s1829_s11  }
  0x42   : > { %s1691_s12 = scalar_lea.hbm %s2361_s6, 512 }
  0x43   : > { %p1692_p6 = scmp.ne.s32.totalorder %s2361_s6, %s1691_s12  ;;  %p1698_p5 = scmp.lt.u32.totalorder %s1691_s12, %s2361_s6 }
  0x45   : > { %p1694_p10 = pnand %p1692_p6, %p1958_p13 }
  0x47   : > { %p1695_p3 = pneg %p1694_p10 }
  0x49   : > { %p1700_p7 = pnand %p1698_p5, %p1695_p3 }
  0x4b   : > { %1703 = shalt.err (!%p1700_p7)
}
  0x4c   : > { %s1704_s23 = scalar_lea.vmem %s324_s28, 512  ;;  %p1712_p1 = scmp.lt.s32.totalorder %s324_s28, %s324_s28 }
  0x4d   : > { %p1705_p9 = scmp.ne.s32.totalorder %s324_s28, %s1704_s23  ;;  %p1713_p2 = scmp.lt.s32.totalorder %s1704_s23, %s1704_s23 }
  0x4f   : > { %p1707_p12 = pnand %p1705_p9, %p1958_p13  ;;  %p1714_p4 = por %p1713_p2, %p1712_p1 }
  0x51   : > { %p1708_p0 = pneg %p1707_p12 }
  0x53   : > { %p1715_p8 = pnand %p1714_p4, %p1708_p0 }
  0x55   : > { %1718 = shalt.err (!%p1715_p8)
}
  0x56   : > { %1551 = dma.hbm_to_vmem [thread:$0]  (!%p1942_p11), %s2361_s6, 512, %s324_s28, [#allocation9], %s1828_s30, %s1828_s30, %s1829_s11  }
  0x57   : > { %s2031_s22 = sadd.s32 1, %s1823_s16   ;;  %s61_s10 = sadd.s32 1, %s1819_s15 }
  0x58   : > { %s58_s24 = ssub.s32 %s1823_s16, %s2031_s22  ;;  %p68_p8 = scmp.ne.s32.totalorder %s1819_s15, %s1815_s14 }
  0x59   : > { %p59_p4 = scmp.eq.s32.totalorder %s58_s24, 0  ;;  %p69_p13 = scmp.eq.s32.totalorder %s1823_s16, 0 }
  0x5a   : > { %p1563_p6 = scmp.lt.s32.totalorder %s1823_s16, 2  ;;  %p2382_p3 = scmp.eq.s32.totalorder %s1912_s17, 1 }
  0x5b   : > { %s2041_s13 = scalar_select %p59_p4, %s1819_s15, %s61_s10  }
  0x5c   : > { %p70_p10 = por %p69_p13, %p68_p8  ;;  %p2045_p5 = por %p2382_p3, %p68_p8 }
  0x5d   : > { %s354_s12 = sand.u32 1, %s1819_s15   ;;  %s1395_s18 = sshll.u32 %s1823_s16, 9 }
  0x5e   : > { %s1359_s28 = sshll.u32 %s354_s12, 5  ;;  %s2054_s29 = scalar_lea.hbm %s2356_s1, %s1395_s18 }
  0x5f   : > { %s358_s23 = scalar_lea.vmem [#allocation2], %s1359_s28  ;;  %p2056_p11 = pnand %p1563_p6, %p70_p10 }
  0x60   : > { %s365_s26 = sshll.u32 %s358_s23, 4  ;;  %s2062_s24 = scalar_lea.sflag [#allocation3], %s354_s12  ;;  %s2060_s26 = int_to_ptr.vmem [resolvable:$true] %s365_s26 }
  0x61   : > { %s1719_s10 = scalar_lea.hbm %s2054_s29, 512  ;;  %p1721_p9 = pneg %p2056_p11 }
  0x62   : > { %p1720_p7 = scmp.ne.s32.totalorder %s2054_s29, %s1719_s10  ;;  %s1724_s25 = scalar_lea.hbm %s2356_s1, 1024 }
  0x63   : > { %p1725_p1 = scmp.lt.u32.totalorder %s2054_s29, %s2356_s1  ;;  %p1726_p2 = scmp.lt.u32.totalorder %s1724_s25, %s1719_s10 }
  0x64   : > { %p1722_p12 = pnand %p1721_p9, %p1720_p7  ;;  %p1728_p8 = scmp.lt.u32.totalorder %s1719_s10, %s2054_s29 }
  0x65   : > { %p1727_p4 = por %p1726_p2, %p1725_p1 }
  0x66   : > { %p1723_p0 = pneg %p1722_p12 }
  0x67   : > { %p1729_p13 = por %p1728_p8, %p1727_p4 }
  0x69   : > { %p1730_p6 = pnand %p1729_p13, %p1723_p0 }
  0x6b   : > { %1733 = shalt.err (!%p1730_p6)
}
  0x6c   : > { %s1734_s12 = scalar_lea.vmem %s2060_s26, 512  ;;  %s1830_s18 = smov [#allocation2]  }
  0x6d   : > { %p1735_p10 = scmp.ne.s32.totalorder %s2060_s26, %s1734_s12  ;;  %s1739_s28 = sshll.u32 %s1830_s18, 4  ;;  %s1740_s28 = int_to_ptr.vmem [resolvable:$false] %s1739_s28 }
  0x6e   : > { %s1741_s27 = scalar_lea.vmem %s1740_s28, 1024  ;;  %p1742_p12 = scmp.lt.s32.totalorder %s2060_s26, %s1740_s28 }
  0x6f   : > { %p1737_p3 = pnand %p1735_p10, %p1721_p9  ;;  %p1743_p1 = scmp.lt.s32.totalorder %s1741_s27, %s1734_s12 }
  0x71   : > { %p1738_p7 = pneg %p1737_p3  ;;  %p1744_p2 = por %p1743_p1, %p1742_p12 }
  0x73   : > { %p1745_p4 = pnand %p1744_p2, %p1738_p7 }
  0x75   : > { %1748 = shalt.err (!%p1745_p4)
}
  0x76   : > { %1555 = dma.hbm_to_vmem [thread:$0]  (!%p2056_p11), %s2054_s29, 512, %s2060_s26, %s2062_s24, %s1828_s30, %s1828_s30, %s1829_s11  }
  0x77   : > { %p2385_p9 = scmp.ne.s32.totalorder %s2379_s21, 0 }
  0x78   : > { %s2096_s10 = sand.u32 (!%p2385_p9), 1, %s1815_s14   ;;  %p2386_p0 = scmp.ne.s32.totalorder (!%p2385_p9), %s2376_s19, 0 }
  0x79   : > { %377 = sbr.rel (%p2385_p9) target bundleno = 1516 (0x5ec), region = 60  ;;  %s1363_s25 = sshll.u32 (!%p2385_p9), %s2096_s10, 5 }
  0x7a   : > { %s380_s23 = scalar_lea.sflag (!%p2385_p9), [#allocation3], %s2096_s10  ;;  %s383_s12 = scalar_lea.vmem (!%p2385_p9), [#allocation2], %s1363_s25 }
  0x80   : > { %1794 = dma.done.wait (%p2386_p0), %s380_s23, 512  }
  0x81   : > { %1796 = vsyncadd (%p2386_p0), %s380_s23, 4294966784  ;;  %p2387_p8 = scmp.eq.s32.totalorder %s1912_s17, 0 }
  0x83   : > { %1798 = dma.done.wait (%p2387_p8), [#allocation6], 1024   ;;  %p2388_p11 = pmov %p2387_p8 }
  0x84   : > { %p2389_p13 = pmov %p2387_p8 }
  0x85   : > { %1800 = vsyncadd (%p2388_p11), [#allocation6], 4294966272 }
  0x86   : > { %1802 = dma.done.wait (%p2389_p13), [#allocation9], 512   ;;  %p2390_p6 = pmov %p2387_p8 }
  0x87   : > { %vm446_vm0 = vcmask 523264   ;;  %v2112_v0 = vld [vmem:[%s383_s12 + $0x10] sm:$0xff]  ;;  %v2114_v1 = vld [vmem:[%s383_s12] sm:$0xff]  ;;  %v2116_v2 = vld [vmem:[%s383_s12 + $0x18] sm:$0xff]  ;;  %vm539_vm1 = vcmask 261120   ;;  %v1831_v18 = vmov 0  }
  0x88   : > { %1804 = vsyncadd (%p2390_p6), [#allocation9], 4294966784  ;;  %v453_v3 = vsel %vm446_vm0, %v2112_v0, 0.0  ;;  %v447_v4 = vsel %vm446_vm0, %v2114_v1, 0.0  ;;  %v2122_v5 = vld [vmem:[%s383_s12 + $0x8] sm:$0xff]  ;;  %v456_v6 = vsel %vm446_vm0, %v2116_v2, 0.0  ;;  %v459_v9 = vmul.f32 %v2114_v1, %v2114_v1  ;;  %1610 = vset.pattern.permute.xlu1 %v1831_v18  ;;  %1609 = vset.pattern.permute.xlu0 %v1831_v18 }
  0x89   : > { %454 = vadd.xlane.f32.xlu1 %v453_v3  ;;  %448 = vadd.xlane.f32.xlu0 %v447_v4  ;;  %v450_v7 = vsel %vm446_vm0, %v2122_v5, 0.0  ;;  %v460_v8 = vmul.f32 %v2122_v5, %v2122_v5  ;;  %v462_v12 = vmul.f32 %v2116_v2, %v2116_v2  ;;  %v461_v13 = vmul.f32 %v2112_v0, %v2112_v0  ;;  %v511_v16 = vld [vmem:[#allocation5] sm:$0xff]  ;;  %v516_v17 = vld [vmem:[%s2358_s3 + $0x8] sm:$0xff]  ;;  %v517_v20 = vld [vmem:[%s2358_s3 + $0x10] sm:$0xff]  ;;  %p437_p10 = scmp.lt.s32.totalorder %s1912_s17, 1  ;;  %s2391_s25 = sld [smem:[#allocation17_spill]] }
  0x8a   : > { %v463_v11 = vsel %vm446_vm0, %v459_v9, 0.0  ;;  %1438 = vmatprep.mubr.msk.f32.mxu1 %vm539_vm1, %v511_v16  ;;  %v515_v19 = vld [vmem:[%s2358_s3] sm:$0xff]  ;;  %v518_v21 = vld [vmem:[%s2358_s3 + $0x18] sm:$0xff]  ;;  %s1397_s24 = sshll.u32 %s1912_s17, 10  ;;  %s2392_s27 = sld [smem:[#allocation18_spill]] }
  0x8b   : > { %v466_v10 = vsel %vm446_vm0, %v460_v8, 0.0  ;;  %v472_v14 = vsel %vm446_vm0, %v462_v12, 0.0  ;;  %v469_v15 = vsel %vm446_vm0, %v461_v13, 0.0  ;;  %v513_v8 = vld [vmem:[#allocation5 + $0x10] sm:$0xff]  ;;  %s438_s29 = scalar_select %p437_p10, %s1912_s17, 1 }
  0x8c   : > { %s1226_s17 = scalar_lea.sflag [#allocation4], %s2096_s10  ;;  %s1833_s19 = smov [#allocation10]  }
  0x8d   : > { %457 = vadd.xlane.f32.xlu1 %v456_v6  ;;  %451 = vadd.xlane.f32.xlu0 %v450_v7  ;;  %s1396_s26 = sshll.u32 %s438_s29, 6  ;;  %s1367_s29 = sshll.u32 %s2096_s10, 6 }
  0x8e   : > { %s441_s18 = scalar_lea.vmem %s2355_s0, %s1396_s26  ;;  %s2288_s26 = scalar_lea.vmem [#allocation10], %s1367_s29 }
  0x8f   : > { %s1239_s9 = sshll.u32 %s2288_s26, 4  ;;  %s1753_s21 = sshll.u32 %s1833_s19, 4  ;;  %s2301_s9 = int_to_ptr.vmem [resolvable:$true] %s1239_s9  ;;  %s1754_s21 = int_to_ptr.vmem [resolvable:$false] %s1753_s21 }
  0x90   : > { %s2308_s23 = scalar_lea.hbm %s2392_s27, %s1397_s24  ;;  %s1749_s12 = scalar_lea.vmem %s2301_s9, 1024 }
  0x91   : > { %467 = vadd.xlane.f32.xlu1 %v466_v10  ;;  %464 = vadd.xlane.f32.xlu0 %v463_v11  ;;  %p1750_p3 = scmp.ne.s32.totalorder %s2301_s9, %s1749_s12  ;;  %s1755_s30 = scalar_lea.vmem %s1754_s21, 2048 }
  0x92   : > { %p1756_p1 = scmp.lt.s32.totalorder %s2301_s9, %s1754_s21  ;;  %p1757_p2 = scmp.lt.s32.totalorder %s1755_s30, %s1749_s12 }
  0x93   : > { %p1751_p7 = pnand %p1750_p3, %p2045_p5 }
  0x94   : > { %p1758_p4 = por %p1757_p2, %p1756_p1 }
  0x95   : > { %473 = vadd.xlane.f32.xlu1 %v472_v14  ;;  %470 = vadd.xlane.f32.xlu0 %v469_v15  ;;  %p1752_p12 = pneg %p1751_p7 }
  0x97   : > { %p1759_p9 = pnand %p1758_p4, %p1752_p12 }
  0xa6   : > { %526 = vperm.xlu1 %1610, %v516_v17  }
  0xaa   : > { %531 = vperm.xlu1 %1610, %v517_v20  }
  0xab   : > { %521 = vperm.xlu0 %1609, %v515_v19  }
  0xae   : > { %536 = vperm.xlu1 %1610, %v518_v21  }
 0x116   : > { %v455_v22 = vpop.xlane.xlu1 %454  ;;  %v449_v23 = vpop.xlane.xlu0 %448 }
 0x117   : > { %v475_v24 = vmul.f32 0.015625, %v449_v23  ;;  %v477_v25 = vmul.f32 0.015625, %v455_v22 }
 0x119   : > { %v479_v26 = vmul.f32 64.0, %v475_v24  ;;  %v481_v34 = vmul.f32 64.0, %v477_v25  ;;  %v495_v55 = vsub.f32 %v2114_v1, %v475_v24  ;;  %v497_v62 = vsub.f32 %v2112_v0, %v477_v25  ;;  %v512_v1 = vld [vmem:[#allocation5 + $0x8] sm:$0xff] }
 0x11a   : > { %v458_v27 = vpop.xlane.xlu1 %457  ;;  %v452_v28 = vpop.xlane.xlu0 %451 }
 0x11b   : > { %v478_v29 = vmul.f32 0.015625, %v458_v27  ;;  %v476_v30 = vmul.f32 0.015625, %v452_v28  ;;  %v483_v32 = vmul.f32 %v479_v26, %v475_v24  ;;  %v485_v42 = vmul.f32 %v481_v34, %v477_v25 }
 0x11d   : > { %v480_v31 = vmul.f32 64.0, %v476_v30  ;;  %v482_v33 = vmul.f32 64.0, %v478_v29  ;;  %v496_v56 = vsub.f32 %v2122_v5, %v476_v30  ;;  %v498_v58 = vsub.f32 %v2116_v2, %v478_v29  ;;  %v514_v2 = vld [vmem:[#allocation5 + $0x18] sm:$0xff] }
 0x11e   : > { %v468_v35 = vpop.xlane.xlu1 %467  ;;  %v465_v36 = vpop.xlane.xlu0 %464 }
 0x11f   : > { %v484_v37 = vmul.f32 %v480_v31, %v476_v30  ;;  %v487_v38 = vsub.f32 %v465_v36, %v483_v32  ;;  %v486_v41 = vmul.f32 %v482_v33, %v478_v29  ;;  %v673_v31 = vld [vmem:[#allocation8] sm:$0xff] }
 0x121   : > { %v488_v39 = vsub.f32 %v468_v35, %v484_v37  ;;  %v491_v40 = vmul.f32 0.015873017, %v487_v38 }
 0x122   : > { %v474_v43 = vpop.xlane.xlu1 %473  ;;  %v471_v44 = vpop.xlane.xlu0 %470 }
 0x123   : > { %v492_v45 = vmul.f32 0.015873017, %v488_v39  ;;  %v499_v46 = vadd.f32 1e-05, %v491_v40  ;;  %v490_v47 = vsub.f32 %v474_v43, %v486_v41  ;;  %v489_v48 = vsub.f32 %v471_v44, %v485_v42 }
 0x125   : > { %v500_v49 = vadd.f32 1e-05, %v492_v45  ;;  %1611 = vrsqrt.f32 %v499_v46  ;;  %v494_v50 = vmul.f32 0.015873017, %v490_v47  ;;  %v493_v51 = vmul.f32 0.015873017, %v489_v48 }
 0x126   : > { %v527_v5 = vpop.permute.xlu1 %526 }
 0x127   : > { %1613 = vrsqrt.f32 %v500_v49  ;;  %v502_v52 = vadd.f32 1e-05, %v494_v50  ;;  %v501_v53 = vadd.f32 1e-05, %v493_v51  ;;  %v674_v50 = vld [vmem:[#allocation8 + $0x8] sm:$0xff]  ;;  %v675_v51 = vld [vmem:[#allocation8 + $0x10] sm:$0xff] }
 0x129   : > { %1615 = vrsqrt.f32 %v502_v52  ;;  %v676_v52 = vld [vmem:[#allocation8 + $0x18] sm:$0xff] }
 0x12a   : > { %1617 = vrsqrt.f32 %v501_v53  ;;  %v532_v0 = vpop.permute.xlu1 %531  ;;  %v522_v9 = vpop.permute.xlu0 %521  ;;  %v778_v53 = vld [vmem:[%s2363_s8] sm:$0xff] }
 0x12b   : > { %1466 = vmatprep.mubr.msk.f32.mxu0 %vm539_vm1, %v778_v53 }
 0x12e   : > { %v537_v15 = vpop.permute.xlu1 %536 }
 0x12f   : > { %v1612_v54 = vpop.eup %1611 }
 0x130   : > { %v507_v59 = vmul.f32 %v1612_v54, %v495_v55  ;;  %v678_v54 = vld [vmem:[%s2362_s7 + $0x8] sm:$0xff]  ;;  %v677_v55 = vld [vmem:[%s2362_s7] sm:$0xff] }
 0x131   : > { %v1614_v57 = vpop.eup %1613 }
 0x132   : > { %v508_v60 = vmul.f32 %v1614_v57, %v496_v56  ;;  %v908_v57 = vld [vmem:[%s2360_s5 + $0x8] sm:$0xff] }
 0x133   : > { %v1616_v61 = vpop.eup %1615 }
 0x134   : > { %v1618_v63 = vpop.eup %1617  ;;  %v1486_v3 = vpack.c.bf16 %v508_v60, %v507_v59  ;;  %v510_v4 = vmul.f32 %v1616_v61, %v498_v58  ;;  %v907_v60 = vld [vmem:[%s2360_s5] sm:$0xff] }
 0x135   : > { %v509_v6 = vmul.f32 %v1618_v63, %v497_v62  ;;  %v680_v62 = vld [vmem:[%s2362_s7 + $0x18] sm:$0xff] }
 0x136   : > { %1487 = vmatprep.subr.bf16.mxu1 %v1486_v3 }
 0x137   : > { %1489 = vmatpush3.bf16.msra.mxu1 %v1486_v3  ;;  %v1490_v7 = vpack.c.bf16 %v510_v4, %v509_v6  ;;  %v679_v3 = vld [vmem:[%s2362_s7 + $0x10] sm:$0xff] }
 0x139   : > { %1491 = vmatprep.subr.bf16.mxu1 %v1490_v7 }
 0x13b   : > { %1493 = vmatpush3.bf16.msra.mxu1 %v1490_v7  ;;  %v910_v7 = vld [vmem:[%s2360_s5 + $0x18] sm:$0xff] }
 0x13e   : > { %1439 = vmatmul.mubr.msk.f32.vlgmr.msra.gmra.mrb[0].mxu1 %vm539_vm1, %v512_v1 }
 0x13f   : > { %1441 = vmatprep.mubr.msk.f32.mxu1 %vm539_vm1, %v513_v8 }
 0x142   : > { %1442 = vmatmul.mubr.msk.f32.gmra.mrb[2].mxu1 %vm539_vm1, %v514_v2  ;;  %v909_v2 = vld [vmem:[%s2360_s5 + $0x10] sm:$0xff] }
 0x143   : > { %1452 = vmatprep.mubr.msk.f32.mxu1 %vm539_vm1, %v673_v31 }
 0x211   : > { %v1440_v10 = vpop.f32.mrb[0].mxu1 }
 0x212   : > { %v624_v11 = vadd.f32 %v1440_v10, %v527_v5  ;;  %v618_v12 = vpop.f32.mrb[1].mxu1 }
 0x213   : > { %v619_v13 = vadd.f32 %v618_v12, %v522_v9  ;;  %v779_v12 = vld [vmem:[%s2363_s8 + $0x8] sm:$0xff] }
 0x214   : > { %v640_v14 = vsel %vm446_vm0, %v624_v11, 0.0  ;;  %v650_v27 = vmul.f32 %v624_v11, %v624_v11 }
 0x215   : > { %641 = vadd.xlane.f32.xlu0 %v640_v14  ;;  %v1443_v16 = vpop.f32.mrb[2].mxu1  ;;  %v637_v17 = vsel %vm446_vm0, %v619_v13, 0.0  ;;  %v649_v25 = vmul.f32 %v619_v13, %v619_v13  ;;  %v780_v13 = vld [vmem:[%s2363_s8 + $0x10] sm:$0xff]  ;;  %v781_v14 = vld [vmem:[%s2363_s8 + $0x18] sm:$0xff] }
 0x216   : > { %v634_v18 = vadd.f32 %v1443_v16, %v537_v15  ;;  %v628_v19 = vpop.f32.mrb[3].mxu1  ;;  %638 = vadd.xlane.f32.xlu1 %v637_v17  ;;  %v656_v28 = vsel %vm446_vm0, %v650_v27, 0.0  ;;  %v2218_v15 = vld [vmem:[%s441_s18 + $0x10] sm:$0xff]  ;;  %v2220_v16 = vld [vmem:[%s441_s18 + $0x18] sm:$0xff] }
 0x217   : > { %v629_v20 = vadd.f32 %v628_v19, %v532_v0  ;;  %v653_v26 = vsel %vm446_vm0, %v649_v25, 0.0  ;;  %v1015_v17 = vadd.f32 %v2220_v16, %v2218_v15  ;;  %v2226_v19 = vld [vmem:[%s441_s18 + $0x28] sm:$0xff]  ;;  %v2242_v27 = vld [vmem:[%s441_s18 + $0x38] sm:$0xff] }
 0x218   : > { %v646_v21 = vsel %vm446_vm0, %v634_v18, 0.0  ;;  %v652_v29 = vmul.f32 %v634_v18, %v634_v18  ;;  %v2224_v18 = vld [vmem:[%s441_s18 + $0x20] sm:$0xff] }
 0x219   : > { %v651_v22 = vmul.f32 %v629_v20, %v629_v20  ;;  %v643_v24 = vsel %vm446_vm0, %v629_v20, 0.0  ;;  %v2228_v20 = vld [vmem:[%s441_s18] sm:$0xff] }
 0x21a   : > { %647 = vadd.xlane.f32.xlu1 %v646_v21  ;;  %v662_v30 = vsel %vm446_vm0, %v652_v29, 0.0  ;;  %v2230_v21 = vld [vmem:[%s441_s18 + $0x8] sm:$0xff]  ;;  %v1028_v29 = vmul.f32 %v2224_v18, %v2224_v18 }
 0x21b   : > { %v659_v23 = vsel %vm446_vm0, %v651_v22, 0.0  ;;  %v1018_v22 = vadd.f32 %v2226_v19, %v2224_v18  ;;  %v1012_v25 = vadd.f32 %v2230_v21, %v2228_v20 }
 0x21c   : > { %660 = vadd.xlane.f32.xlu0 %v659_v23  ;;  %v1024_v23 = vmul.f32 %v2228_v20, %v2228_v20 }
 0x21e   : > { %644 = vadd.xlane.f32.xlu1 %v643_v24  ;;  %v1025_v24 = vmul.f32 %v2230_v21, %v2230_v21 }
 0x222   : > { %654 = vadd.xlane.f32.xlu1 %v653_v26  ;;  %v2240_v26 = vld [vmem:[%s441_s18 + $0x30] sm:$0xff] }
 0x223   : > { %v1021_v31 = vadd.f32 %v2242_v27, %v2240_v26 }
 0x226   : > { %657 = vadd.xlane.f32.xlu1 %v656_v28  ;;  %v1032_v28 = vadd.f32 %v1025_v24, %v1024_v23 }
 0x22a   : > { %663 = vadd.xlane.f32.xlu1 %v662_v30  ;;  %v1029_v30 = vmul.f32 %v2226_v19, %v2226_v19 }
 0x2a2   : > { %v642_v33 = vpop.xlane.xlu0 %641 }
 0x2a3   : > { %v639_v32 = vpop.xlane.xlu1 %638 }
 0x2a4   : > { %1619 = vrcp.f32 %v639_v32  ;;  %v1026_v32 = vmul.f32 %v2218_v15, %v2218_v15 }
 0x2a5   : > { %1621 = vrcp.f32 %v642_v33  ;;  %v1027_v33 = vmul.f32 %v2220_v16, %v2220_v16 }
 0x2a7   : > { %v648_v34 = vpop.xlane.xlu1 %647 }
 0x2a9   : > { %v661_v43 = vpop.xlane.xlu0 %660 }
 0x2ab   : > { %v645_v35 = vpop.xlane.xlu1 %644 }
 0x2ac   : > { %1623 = vrcp.f32 %v645_v35  ;;  %v1035_v35 = vadd.f32 %v1027_v33, %v1026_v32 }
 0x2ad   : > { %1625 = vrcp.f32 %v648_v34  ;;  %v1038_v34 = vadd.f32 %v1029_v30, %v1028_v29 }
 0x2ae   : > { %v1620_v37 = vpop.eup %1619 }
 0x2af   : > { %v655_v36 = vpop.xlane.xlu1 %654  ;;  %v1622_v38 = vpop.eup %1621 }
 0x2b0   : > { %v666_v40 = vmul.f32 %v1620_v37, %v655_v36  ;;  %v1030_v36 = vmul.f32 %v2240_v26, %v2240_v26  ;;  %v1031_v37 = vmul.f32 %v2242_v27, %v2242_v27 }
 0x2b3   : > { %v658_v39 = vpop.xlane.xlu1 %657 }
 0x2b4   : > { %v668_v41 = vmul.f32 %v1622_v38, %v658_v39  ;;  %v1041_v38 = vadd.f32 %v1031_v37, %v1030_v36  ;;  %v783_v39 = vld [vmem:[#allocation7 + $0x8] sm:$0xff] }
 0x2b6   : > { %v1624_v42 = vpop.eup %1623  ;;  %v1494_v44 = vpack.c.bf16 %v668_v41, %v666_v40  ;;  %v782_v40 = vld [vmem:[#allocation7] sm:$0xff] }
 0x2b7   : > { %v1626_v45 = vpop.eup %1625  ;;  %v664_v46 = vpop.xlane.xlu1 %663  ;;  %v670_v47 = vmul.f32 %v1624_v42, %v661_v43 }
 0x2b8   : > { %v672_v48 = vmul.f32 %v1626_v45, %v664_v46  ;;  %1495 = vmatprep.subr.bf16.mxu1 %v1494_v44  ;;  %v784_v45 = vld [vmem:[#allocation7 + $0x10] sm:$0xff]  ;;  %v785_v46 = vld [vmem:[#allocation7 + $0x18] sm:$0xff] }
 0x2b9   : > { %1497 = vmatpush3.bf16.msra.mxu1 %v1494_v44 }
 0x2ba   : > { %v1498_v49 = vpack.c.bf16 %v672_v48, %v670_v47 }
 0x2bc   : > { %1499 = vmatprep.subr.bf16.mxu1 %v1498_v49 }
 0x2bd   : > { %1501 = vmatpush3.bf16.msra.mxu1 %v1498_v49 }
 0x2c0   : > { %1453 = vmatmul.mubr.msk.f32.vlgmr.msra.gmra.mrb[4].mxu1 %vm539_vm1, %v674_v50 }
 0x2c1   : > { %1455 = vmatprep.mubr.msk.f32.mxu1 %vm539_vm1, %v675_v51 }
 0x2c4   : > { %1456 = vmatmul.mubr.msk.f32.gmra.mrb[6].mxu1 %vm539_vm1, %v676_v52 }
 0x2c5   : > { %1480 = vmatprep.mubr.msk.f32.mxu1 %vm539_vm1, %v778_v53 }
 0x393   : > { %v1454_v56 = vpop.f32.mrb[4].mxu1 }
 0x394   : > { %v765_v58 = vadd.f32 %v1454_v56, %v678_v54  ;;  %v759_v59 = vpop.f32.mrb[5].mxu1 }
 0x395   : > { %v760_v61 = vadd.f32 %v759_v59, %v677_v55 }
 0x396   : > { %v912_v63 = vmul.f32 %v908_v57, %v765_v58  ;;  %793 = vperm.xlu1 %1610, %v765_v58  }
 0x397   : > { %v911_v4 = vmul.f32 %v907_v60, %v760_v61  ;;  %v1457_v6 = vpop.f32.mrb[6].mxu1  ;;  %788 = vperm.xlu0 %1609, %v760_v61  }
 0x398   : > { %v775_v1 = vadd.f32 %v1457_v6, %v680_v62  ;;  %v769_v8 = vpop.f32.mrb[7].mxu1 }
 0x399   : > { %v770_v5 = vadd.f32 %v769_v8, %v679_v3  ;;  %v1510_v0 = vpack.c.bf16 %v912_v63, %v911_v4 }
 0x39a   : > { %v914_v9 = vmul.f32 %v910_v7, %v775_v1 }
 0x39b   : > { %v913_v10 = vmul.f32 %v909_v2, %v770_v5  ;;  %798 = vperm.xlu1 %1610, %v770_v5   ;;  %803 = vperm.xlu0 %1609, %v775_v1  }
 0x39c   : > { %1511 = vmatprep.subr.bf16.mxu1 %v1510_v0 }
 0x39d   : > { %1513 = vmatpush3.bf16.msra.mxu1 %v1510_v0  ;;  %v1514_v11 = vpack.c.bf16 %v914_v9, %v913_v10 }
 0x39f   : > { %1515 = vmatprep.subr.bf16.mxu1 %v1514_v11 }
 0x3a1   : > { %1517 = vmatpush3.bf16.msra.mxu1 %v1514_v11 }
 0x3a4   : > { %1481 = vmatmul.mubr.msk.f32.vlgmr.msra.gmra.mrb[8].mxu1 %vm539_vm1, %v779_v12 }
 0x3a5   : > { %1483 = vmatprep.mubr.msk.f32.mxu1 %vm539_vm1, %v780_v13 }
 0x3a8   : > { %1484 = vmatmul.mubr.msk.f32.gmra.mrb[10].mxu1 %vm539_vm1, %v781_v14 }
 0x3ba   : > { %1016 = vadd.xlane.f32.xlu0 %v1015_v17 }
 0x3be   : > { %1019 = vadd.xlane.f32.xlu0 %v1018_v22 }
 0x3bf   : > { %1013 = vadd.xlane.f32.xlu1 %v1012_v25 }
 0x3c2   : > { %1033 = vadd.xlane.f32.xlu0 %v1032_v28 }
 0x3c3   : > { %1022 = vadd.xlane.f32.xlu1 %v1021_v31 }
 0x3c6   : > { %1039 = vadd.xlane.f32.xlu0 %v1038_v34 }
 0x3c7   : > { %1036 = vadd.xlane.f32.xlu1 %v1035_v35 }
 0x3cb   : > { %1042 = vadd.xlane.f32.xlu1 %v1041_v38 }
 0x415   : > { %v794_v41 = vpop.permute.xlu1 %793 }
 0x416   : > { %v807_v42 = vmul.f32 %v794_v41, %v783_v39  ;;  %v789_v43 = vpop.permute.xlu0 %788 }
 0x417   : > { %v806_v44 = vmul.f32 %v789_v43, %v782_v40 }
 0x419   : > { %v1502_v47 = vpack.c.bf16 %v807_v42, %v806_v44 }
 0x41a   : > { %v799_v48 = vpop.permute.xlu1 %798  ;;  %v804_v49 = vpop.permute.xlu0 %803 }
 0x41b   : > { %v808_v50 = vmul.f32 %v799_v48, %v784_v45  ;;  %v809_v51 = vmul.f32 %v804_v49, %v785_v46  ;;  %1503 = vmatprep.subr.bf16.mxu0 %v1502_v47 }
 0x41c   : > { %1505 = vmatpush3.bf16.msra.mxu0 %v1502_v47 }
 0x41d   : > { %v1506_v52 = vpack.c.bf16 %v809_v51, %v808_v50 }
 0x41f   : > { %1507 = vmatprep.subr.bf16.mxu0 %v1506_v52 }
 0x420   : > { %1509 = vmatpush3.bf16.msra.mxu0 %v1506_v52 }
 0x423   : > { %1467 = vmatmul.mubr.msk.f32.vlgmr.msra.gmra.mrb[0].mxu0 %vm539_vm1, %v779_v12 }
 0x424   : > { %1469 = vmatprep.mubr.msk.f32.mxu0 %vm539_vm1, %v780_v13 }
 0x427   : > { %1470 = vmatmul.mubr.msk.f32.gmra.mrb[2].mxu0 %vm539_vm1, %v781_v14 }
 0x447   : > { %v1017_v53 = vpop.xlane.xlu0 %1016 }
 0x448   : > { %v1045_v54 = vmul.f32 0.00390625, %v1017_v53  ;;  %v916_v53 = vld [vmem:[%s2391_s25 + $0x8] sm:$0xff] }
 0x44a   : > { %v1049_v59 = vmul.f32 256.0, %v1045_v54  ;;  %v1066_v31 = vsub.f32 %v2218_v15, %v1045_v54  ;;  %v1067_v32 = vsub.f32 %v2220_v16, %v1045_v54 }
 0x44b   : > { %v1020_v55 = vpop.xlane.xlu0 %1019 }
 0x44c   : > { %v1014_v56 = vpop.xlane.xlu1 %1013  ;;  %v1046_v57 = vmul.f32 0.00390625, %v1020_v55  ;;  %v1053_v6 = vmul.f32 %v1049_v59, %v1045_v54  ;;  %v915_v54 = vld [vmem:[%s2391_s25] sm:$0xff] }
 0x44d   : > { %v1044_v58 = vmul.f32 0.00390625, %v1014_v56 }
 0x44e   : > { %v1050_v60 = vmul.f32 256.0, %v1046_v57  ;;  %v1068_v35 = vsub.f32 %v2224_v18, %v1046_v57  ;;  %v1069_v38 = vsub.f32 %v2226_v19, %v1046_v57 }
 0x44f   : > { %v1048_v61 = vmul.f32 256.0, %v1044_v58  ;;  %v1034_v62 = vpop.xlane.xlu0 %1033  ;;  %v1064_v29 = vsub.f32 %v2228_v20, %v1044_v58  ;;  %v1065_v30 = vsub.f32 %v2230_v21, %v1044_v58 }
 0x450   : > { %v1023_v63 = vpop.xlane.xlu1 %1022  ;;  %v1054_v3 = vmul.f32 %v1050_v60, %v1046_v57  ;;  %v918_v60 = vld [vmem:[%s2391_s25 + $0x18] sm:$0xff] }
 0x451   : > { %v1047_v4 = vmul.f32 0.00390625, %v1023_v63  ;;  %v1052_v7 = vmul.f32 %v1048_v61, %v1044_v58  ;;  %v1832_v58 = vmov 0.0   ;;  %v917_v61 = vld [vmem:[%s2391_s25 + $0x10] sm:$0xff] }
 0x452   : > { %1184 = vmatprep.mubr.f32.mxu0 %v1832_v58 }
 0x453   : > { %v1056_v1 = vsub.f32 %v1034_v62, %v1052_v7  ;;  %v1051_v8 = vmul.f32 256.0, %v1047_v4  ;;  %v1040_v2 = vpop.xlane.xlu0 %1039  ;;  %v1070_v40 = vsub.f32 %v2240_v26, %v1047_v4  ;;  %v1071_v43 = vsub.f32 %v2242_v27, %v1047_v4 }
 0x454   : > { %v1037_v5 = vpop.xlane.xlu1 %1036  ;;  %v1058_v0 = vsub.f32 %v1040_v2, %v1054_v3 }
 0x455   : > { %v1057_v9 = vsub.f32 %v1037_v5, %v1053_v6  ;;  %v1060_v10 = vmul.f32 0.003921569, %v1056_v1  ;;  %v1055_v11 = vmul.f32 %v1051_v8, %v1047_v4 }
 0x456   : > { %v1062_v12 = vmul.f32 0.003921569, %v1058_v0 }
 0x457   : > { %v1061_v13 = vmul.f32 0.003921569, %v1057_v9  ;;  %v1072_v14 = vadd.f32 1e-05, %v1060_v10 }
 0x458   : > { %v1043_v17 = vpop.xlane.xlu1 %1042  ;;  %v1074_v22 = vadd.f32 1e-05, %v1062_v12 }
 0x459   : > { %v1073_v23 = vadd.f32 1e-05, %v1061_v13  ;;  %1627 = vrsqrt.f32 %v1072_v14  ;;  %v1059_v24 = vsub.f32 %v1043_v17, %v1055_v11 }
 0x45a   : > { %1629 = vrsqrt.f32 %v1074_v22 }
 0x45b   : > { %1631 = vrsqrt.f32 %v1073_v23  ;;  %v1063_v25 = vmul.f32 0.003921569, %v1059_v24 }
 0x45d   : > { %v1075_v28 = vadd.f32 1e-05, %v1063_v25 }
 0x45f   : > { %1633 = vrsqrt.f32 %v1075_v28 }
 0x463   : > { %v1628_v33 = vpop.eup %1627 }
 0x464   : > { %v1630_v34 = vpop.eup %1629  ;;  %v1081_v36 = vmul.f32 %v1628_v33, %v1065_v30  ;;  %v1080_v37 = vmul.f32 %v1628_v33, %v1064_v29 }
 0x465   : > { %v1632_v39 = vpop.eup %1631  ;;  %v1085_v46 = vmul.f32 %v1630_v34, %v1069_v38  ;;  %v1084_v47 = vmul.f32 %v1630_v34, %v1068_v35 }
 0x466   : > { %v1083_v41 = vmul.f32 %v1632_v39, %v1067_v32  ;;  %v1082_v42 = vmul.f32 %v1632_v39, %v1066_v31 }
 0x468   : > { %v1518_v44 = vpack.c.bf16 %v1083_v41, %v1081_v36  ;;  %v1520_v45 = vpack.c.bf16 %v1082_v42, %v1080_v37 }
 0x469   : > { %v1634_v48 = vpop.eup %1633 }
 0x46a   : > { %1519 = vmatprep.subr.bf16.mxu0 %v1518_v44  ;;  %v1087_v49 = vmul.f32 %v1634_v48, %v1071_v43  ;;  %v1086_v50 = vmul.f32 %v1634_v48, %v1070_v40 }
 0x46b   : > { %1521 = vmatpush1.bf16.msra.mxu0 %v1520_v45 }
 0x46c   : > { %v1522_v51 = vpack.c.bf16 %v1087_v49, %v1085_v46  ;;  %v1524_v52 = vpack.c.bf16 %v1086_v50, %v1084_v47 }
 0x46e   : > { %1523 = vmatprep.subr.bf16.mxu0 %v1522_v51 }
 0x46f   : > { %1525 = vmatpush1.bf16.msra.mxu0 %v1524_v52 }
 0x477   : > { %v1482_v55 = vpop.f32.mrb[8].mxu1 }
 0x478   : > { %v991_v56 = vadd.f32 %v1482_v55, %v916_v53  ;;  %v985_v57 = vpop.f32.mrb[9].mxu1 }
 0x479   : > { %v986_v59 = vadd.f32 %v985_v57, %v915_v54 }
 0x47a   : > { %1095 = vperm.xlu1 %1610, %v991_v56  }
 0x47b   : > { %v1485_v62 = vpop.f32.mrb[10].mxu1  ;;  %1090 = vperm.xlu0 %1609, %v986_v59  }
 0x47c   : > { %v1001_v63 = vadd.f32 %v1485_v62, %v918_v60  ;;  %v995_v3 = vpop.f32.mrb[11].mxu1 }
 0x47d   : > { %v996_v4 = vadd.f32 %v995_v3, %v917_v61 }
 0x47f   : > { %1100 = vperm.xlu1 %1610, %v996_v4   ;;  %1105 = vperm.xlu0 %1609, %v1001_v63  }
 0x4f6   : > { %v1468_v6 = vpop.f32.mrb[0].mxu0 }
 0x4f7   : > { %v888_v7 = vpop.f32.mrb[1].mxu0 }
 0x4f8   : > { %1386 = vmatmul.mubr.msk.f32.vlgmr.msra.gmra.mrb[4].mxu0 %vm539_vm1, %v888_v7 }
 0x4f9   : > { %1190 = vmatprep.mubr.f32.mxu0 %v1832_v58  ;;  %v1096_v10 = vpop.permute.xlu1 %1095 }
 0x4fa   : > { %v1471_v1 = vpop.f32.mrb[2].mxu0  ;;  %v1091_v2 = vpop.permute.xlu0 %1090 }
 0x4fb   : > { %v898_v8 = vpop.f32.mrb[3].mxu0 }
 0x4fc   : > { %1387 = vmatmul.mubr.msk.f32.gmra.mrb[6].mxu0 %vm539_vm1, %v1468_v6 }
 0x4fd   : > { %1196 = vmatprep.mubr.f32.mxu0 %v1832_v58 }
 0x4fe   : > { %v1106_v32 = vpop.permute.xlu0 %1105 }
 0x500   : > { %1388 = vmatmul.mubr.msk.f32.gmra.mrb[8].mxu0 %vm539_vm1, %v898_v8 }
 0x501   : > { %1202 = vmatprep.mubr.f32.mxu0 %v1832_v58 }
 0x504   : > { %1389 = vmatmul.mubr.msk.f32.gmra.mrb[10].mxu0 %vm539_vm1, %v1471_v1 }
 0x5cb   : > { %v1186_v5 = vpop.f32.mrb[4].mxu0 }
 0x5cc   : > { %v1187_v0 = vadd.f32 %v1186_v5, %v1091_v2  ;;  %v1188_v9 = vpop.f32.mrb[5].mxu0 }
 0x5cd   : > { %v1189_v11 = vadd.f32 %v1188_v9, %v1091_v2 }
 0x5ce   : > { %v1209_v12 = vadd.f32 %v1187_v0, %v2228_v20  ;;  %v1101_v20 = vpop.permute.xlu1 %1100 }
 0x5cf   : > { %v1210_v13 = vadd.f32 %v1189_v11, %v2230_v21  ;;  %v1192_v14 = vpop.f32.mrb[6].mxu0 }
 0x5d0   : > { %1217 = vst [vmem:[%s2288_s26] sm:$0xff] %v1209_v12  ;;  %v1193_v17 = vadd.f32 %v1192_v14, %v1096_v10  ;;  %v1194_v22 = vpop.f32.mrb[7].mxu0 }
 0x5d1   : > { %1218 = vst [vmem:[%s2288_s26 + $0x8] sm:$0xff] %v1210_v13  ;;  %v1195_v23 = vadd.f32 %v1194_v22, %v1096_v10 }
 0x5d2   : > { %v1211_v24 = vadd.f32 %v1193_v17, %v2218_v15 }
 0x5d3   : > { %v1212_v21 = vadd.f32 %v1195_v23, %v2220_v16  ;;  %v1198_v25 = vpop.f32.mrb[8].mxu0 }
 0x5d4   : > { %1219 = vst [vmem:[%s2288_s26 + $0x10] sm:$0xff] %v1211_v24  ;;  %v1199_v28 = vadd.f32 %v1198_v25, %v1101_v20  ;;  %v1200_v29 = vpop.f32.mrb[9].mxu0 }
 0x5d5   : > { %1220 = vst [vmem:[%s2288_s26 + $0x18] sm:$0xff] %v1212_v21  ;;  %v1201_v30 = vadd.f32 %v1200_v29, %v1101_v20 }
 0x5d6   : > { %v1213_v31 = vadd.f32 %v1199_v28, %v2224_v18 }
 0x5d7   : > { %v1214_v33 = vadd.f32 %v1201_v30, %v2226_v19  ;;  %v1204_v15 = vpop.f32.mrb[10].mxu0 }
 0x5d8   : > { %1221 = vst [vmem:[%s2288_s26 + $0x20] sm:$0xff] %v1213_v31  ;;  %v1205_v16 = vadd.f32 %v1204_v15, %v1106_v32  ;;  %v1206_v34 = vpop.f32.mrb[11].mxu0 }
 0x5d9   : > { %1222 = vst [vmem:[%s2288_s26 + $0x28] sm:$0xff] %v1214_v33  ;;  %v1207_v35 = vadd.f32 %v1206_v34, %v1106_v32 }
 0x5da   : > { %v1215_v36 = vadd.f32 %v1205_v16, %v2240_v26 }
 0x5db   : > { %v1216_v18 = vadd.f32 %v1207_v35, %v2242_v27 }
 0x5dc   : > { %1223 = vst [vmem:[%s2288_s26 + $0x30] sm:$0xff] %v1215_v36 }
 0x5dd   : > { %1224 = vst [vmem:[%s2288_s26 + $0x38] sm:$0xff] %v1216_v18 }
 0x5de   : > { %1762 = shalt.err (!%p1759_p9)
}
 0x5df   : > { %s1763_s11 = scalar_lea.hbm %s2308_s23, 1024  ;;  %s1767_s24 = scalar_lea.hbm %s2392_s27, 2048 }
 0x5e0   : > { %p1764_p0 = scmp.ne.s32.totalorder %s2308_s23, %s1763_s11  ;;  %p1768_p13 = scmp.lt.u32.totalorder %s2308_s23, %s2392_s27 }
 0x5e1   : > { %p1769_p6 = scmp.lt.u32.totalorder %s1767_s24, %s1763_s11  ;;  %p1771_p3 = scmp.lt.u32.totalorder %s1763_s11, %s2308_s23 }
 0x5e2   : > { %p1765_p8 = pnand %p1764_p0, %p2045_p5 }
 0x5e3   : > { %p1770_p10 = por %p1769_p6, %p1768_p13 }
 0x5e4   : > { %p1766_p11 = pneg %p1765_p8 }
 0x5e5   : > { %p1772_p7 = por %p1771_p3, %p1770_p10 }
 0x5e7   : > { %p1773_p12 = pnand %p1772_p7, %p1766_p11 }
 0x5e9   : > { %1776 = shalt.err (!%p1773_p12)
}
 0x5ea   : > { %s1834_s12 = smov 256   ;;  %s1835_s19 = smov 16  }
 0x5eb   : > { %1540 = dma.vmem_to_hbm [thread:$0]  (%p2045_p5), %s2301_s9, 1024, %s2308_s23, %s1226_s17, %s1834_s12, %s1834_s12, %s1835_s19  }
 0x5ec PF: > { %s2393_s21 = sld [smem:[#allocation15_spill]]  ;;  %s2394_s30 = sld [smem:[#allocation16_spill]] }
 0x5ed   : > { %p2396_p2 = scmp.ge.s32.totalorder %s1823_s16, 2 }
 0x5f2   : > { %s1254_s29 = sand.u32 1, %s2393_s21   ;;  %p2395_p1 = scmp.ne.s32.totalorder %s2394_s30, 0 }
 0x5f3   : > { %s1255_s11 = scalar_lea.sflag [#allocation4], %s1254_s29 }
 0x5f4   : > { %p1557_p4 = pnand %p2396_p2, %p2395_p1 }
 0x5f6   : > { %1806 = dma.done.wait (!%p1557_p4), %s1255_s11, 1024  }
 0x5f7   : > { %1808 = vsyncadd (!%p1557_p4), %s1255_s11, 4294966272  ;;  %s2397_s26 = smov %s2041_s13  ;;  %p25_p9 = scmp.ge.s32.totalorder %s2031_s22, 4  }
 0x5f8   : > { %s2398_s13 = smov %s1815_s14  ;;  %s2399_s14 = smov %s1819_s15 }
 0x5f9   : > { %s2400_s15 = smov %s2397_s26  ;;  %s2401_s16 = smov %s2031_s22 }
 0x5fa   :  { %27 = sbr.rel (!%p25_p9) target bundleno = 10 (0xa), region = 120 }
 0x601   :  { %1260 = vsyncpa [#allocation3], 1 }
 0x602   :  { %1262 = vsyncpa [#allocation3 + $0x1], 1 }
 0x603   :  { %1263 = vsyncpa [#allocation6], 1 }
 0x604   :  { %1264 = vsyncpa [#allocation9], 1 }
 0x605   :  { %1265 = vsyncpa [#allocation4], 1 }
 0x606   :  { %1267 = vsyncpa [#allocation4 + $0x1], 1 }

</bundles_post_ra>
